<compile_context>
chip_gen: v5e
topology: v5e:2x2
jax: 0.10.0
libtpu: 0.0.40
codegen_flags: <defaults>
</compile_context>

<pallas_src>
import math
import functools

import jax
import jax.numpy as jnp
from jax.experimental import pallas as pl
from jax.experimental.pallas import tpu as pltpu


# Padded-VMEM budget for all live blocks (x*2 + out*2 + pe*2 buffers) and the
# explicit scoped-VMEM limit.  48 MiB is below v7x's 64 MiB physical VMEM and
# well below v5e/v6e physical; 28 MiB total leaves compiler headroom.
_TOTAL_VMEM_BUDGET = 28 << 20
_VMEM_LIMIT_BYTES = 48 << 20


def _cdiv(a: int, b: int) -> int:
    return -(-a // b)


def _sublane_pack(itemsize: int) -> int:
    """Native second-minor tile extent per element width (f32:8, bf16:16, i8:32)."""
    return {4: 8, 2: 16, 1: 32}.get(itemsize, 8)


def make_positional_encoding(seq_len: int, d_model: int, dtype=jnp.float32):
    """Deterministic sinusoidal PE table, same math as the PyTorch __init__."""
    position = jnp.arange(seq_len, dtype=jnp.float32)[:, None]                      # (S, 1)
    div_term = jnp.exp(
        jnp.arange(0, d_model, 2, dtype=jnp.float32) * (-math.log(10000.0) / d_model)
    )                                                                               # (D/2,)
    pe = jnp.zeros((seq_len, d_model), dtype=jnp.float32)
    pe = pe.at[:, 0::2].set(jnp.sin(position * div_term))
    pe = pe.at[:, 1::2].set(jnp.cos(position * div_term))
    return pe.astype(dtype)


# ---------------------------------------------------------------------------
# Kernels
# ---------------------------------------------------------------------------
def _dropout(y, seed_ref, step, keep_threshold, inv_keep):
    """Inverted dropout: keep iff bits >= round(p*2^32)  =>  P(keep) = 1 - p."""
    pltpu.prng_seed(seed_ref[0] + step)                      # distinct stream per tile
    bits = pltpu.bitcast(pltpu.prng_random_bits(y.shape), jnp.uint32)
    keep = bits >= jnp.uint32(keep_threshold)
    return jnp.where(keep, y * jnp.asarray(inv_keep, dtype=y.dtype),
                     jnp.zeros_like(y))


def _pe_kernel_2d(seed_ref, x_ref, pe_ref, o_ref, *,
                  keep_threshold, inv_keep, apply_dropout):
    """x_ref: (B, TL) slab, pe_ref: (1, TL) slab (broadcast over rows)."""
    y = x_ref[...] + pe_ref[...]
    if apply_dropout:
        y = _dropout(y, seed_ref, pl.program_id(0), keep_threshold, inv_keep)
    o_ref[...] = y.astype(o_ref.dtype)


def _pe_kernel_3d(seed_ref, x_ref, pe_ref, o_ref, *,
                  keep_threshold, inv_keep, apply_dropout):
    """x_ref: (TB, TS, D), pe_ref: (TS, D) broadcast over the batch tile."""
    y = x_ref[...] + pe_ref[...][None, :, :]
    if apply_dropout:
        step = pl.program_id(0) * pl.num_programs(1) + pl.program_id(1)
        y = _dropout(y, seed_ref, step, keep_threshold, inv_keep)
    o_ref[...] = y.astype(o_ref.dtype)


# ---------------------------------------------------------------------------
# Padding-aware tile choosers
# ---------------------------------------------------------------------------
def _choose_col_tile(L: int, B: int, itemsize: int) -> int:
    """Column tile (multiple of 128, or == L if L<=128) for the 2D (B, L) path."""
    sub = _sublane_pack(itemsize)
    pad_rows = _cdiv(B, sub) * sub      # x / out blocks pad B up to a sublane tile
    pe_rows = sub                       # the (1, TL) pe block always pads to `sub` rows
    # Live at once: x (2 bufs) + out (2 bufs) + pe (2 bufs).
    bytes_per_lane = itemsize * (2 * pad_rows + 2 * pad_rows + 2 * pe_rows)
    if L <= 128:
        return L
    max_tl = max(128, (_TOTAL_VMEM_BUDGET // bytes_per_lane) // 128 * 128)
    tl = min(max_tl, _cdiv(L, 128) * 128)
    # Guarantee >= 2 grid steps (v7x has 2 TensorCores) whenever splittable.
    while _cdiv(L, tl) < 2 and tl > 128:
        tl = max(128, _cdiv(tl // 2, 128) * 128)
    return tl


def _choose_tiles_3d(B: int, S: int, D: int, itemsize: int):
    """(batch tile, seq tile) for the 3D (B, S, D) path (D % 128 == 0)."""
    sub = _sublane_pack(itemsize)

    def total(tb, ts):
        pad_ts = _cdiv(ts, sub) * sub
        # x (2 bufs) + out (2 bufs) of (tb, pad_ts, D) + pe (2 bufs) of (pad_ts, D)
        return itemsize * D * pad_ts * (4 * tb + 2)

    ts = S if S < sub else (S // sub) * sub
    tb = B
    while total(tb, ts) > _TOTAL_VMEM_BUDGET and ts > sub:
        ts = max(sub, ((ts // 2) // sub) * sub)
    while total(tb, ts) > _TOTAL_VMEM_BUDGET and tb > 1:
        tb = max(1, tb // 2)

    # Guarantee >= 2 "parallel" grid steps for v7x when the tensor is splittable.
    if _cdiv(B, tb) * _cdiv(S, ts) < 2:
        if S >= 2 * sub:
            ts = max(sub, _cdiv(_cdiv(S, 2), sub) * sub)
        elif B > 1:
            tb = _cdiv(B, 2)
    return tb, ts


# ---------------------------------------------------------------------------
# Forward
# ---------------------------------------------------------------------------
def positional_encoding_forward(x, pe, *, dropout_p=0.0, training=False, seed=0):
    """Equivalent of PositionalEncoding.forward(x).

    x:  (B, S, D)
    pe: (seq_len, D) with seq_len >= S
    """
    if not (0.0 <= float(dropout_p) < 1.0):
        raise ValueError("dropout_p must be in [0, 1)")

    B, S, D = x.shape
    itemsize = jnp.dtype(x.dtype).itemsize

    apply_dropout = bool(training) and float(dropout_p) > 0.0
    keep_threshold = min(int(round(float(dropout_p) * (1 << 32))), (1 << 32) - 1)
    inv_keep = 1.0 / (1.0 - float(dropout_p)) if apply_dropout else 1.0

    pe_s = pe[:S, :].astype(x.dtype)          # self.pe[:, :x.size(1)]
    seed_arr = jnp.array([seed], dtype=jnp.int32)

    static = dict(keep_threshold=keep_threshold, inv_keep=inv_keep,
                  apply_dropout=apply_dropout)
    cparams = pltpu.CompilerParams  # alias

    if D % 128 == 0:
        # 3D path: lanes = D (unmasked stores), sublanes = sequence tile
        # (dense even for small batch), pe broadcasts over the batch tile.
        tb, ts = _choose_tiles_3d(B, S, D, itemsize)
        grid = (_cdiv(B, tb), _cdiv(S, ts))
        out = pl.pallas_call(
            functools.partial(_pe_kernel_3d, **static),
            out_shape=jax.ShapeDtypeStruct((B, S, D), x.dtype),
            grid_spec=pltpu.PrefetchScalarGridSpec(
                num_scalar_prefetch=1,
                grid=grid,
                in_specs=[
                    pl.BlockSpec((tb, ts, D), lambda b, s, seed: (b, s, 0)),
                    pl.BlockSpec((ts, D), lambda b, s, seed: (s, 0)),
                ],
                out_specs=pl.BlockSpec((tb, ts, D), lambda b, s, seed: (b, s, 0)),
            ),
            compiler_params=cparams(
                dimension_semantics=("parallel", "parallel"),
                vmem_limit_bytes=_VMEM_LIMIT_BYTES,
            ),
            cost_estimate=pl.CostEstimate(
                flops=B * S * D, transcendentals=0,
                bytes_accessed=(2 * B * S * D + S * D) * itemsize),
        )(seed_arr, x, pe_s)
        return out

    # 2D slab path (D not a multiple of 128): flatten to a lane-dense (B, S*D)
    # slab with 128-multiple column tiles so stores are unmasked vst.
    # TODO(synk): for B < 8 this path still wastes sublanes (x block padded to
    # 8 rows); folding sequence groups into the sublane dim would need a
    # modular pe broadcast and only matters for tiny small-batch tensors.
    L = S * D
    TL = _choose_col_tile(L, B, itemsize)
    grid = (_cdiv(L, TL),)
    x2 = x.reshape(B, L)
    pe2 = pe_s.reshape(1, L)
    out2 = pl.pallas_call(
        functools.partial(_pe_kernel_2d, **static),
        out_shape=jax.ShapeDtypeStruct((B, L), x.dtype),
        grid_spec=pltpu.PrefetchScalarGridSpec(
            num_scalar_prefetch=1,
            grid=grid,
            in_specs=[
                pl.BlockSpec((B, TL), lambda l, seed: (0, l)),   # x slab tile
                pl.BlockSpec((1, TL), lambda l, seed: (0, l)),   # pe tile (bcast)
            ],
            out_specs=pl.BlockSpec((B, TL), lambda l, seed: (0, l)),
        ),
        compiler_params=cparams(
            dimension_semantics=("parallel",),
            vmem_limit_bytes=_VMEM_LIMIT_BYTES,
        ),
        cost_estimate=pl.CostEstimate(
            flops=B * L, transcendentals=0,
            bytes_accessed=(2 * B * L + L) * itemsize),
    )(seed_arr, x2, pe2)
    return out2.reshape(B, S, D)


if __name__ == "__main__":
    key = jax.random.PRNGKey(0)

    # --- Case 1: module-like small shape (d_model=32 -> 2D slab path) -------
    d_model, seq_len, batch, seq = 32, 16, 2, 8
    k1, k2 = jax.random.split(key)
    x = jax.random.normal(k1, (batch, seq, d_model), dtype=jnp.float32)
    pe = make_positional_encoding(seq_len, d_model, dtype=jnp.float32)

    # Eval-mode forward (dropout is identity) -> exactly reproducible reference.
    out = positional_encoding_forward(x, pe, dropout_p=0.1, training=False)
    out = jax.block_until_ready(out)
    ref = x + pe[:seq][None, :, :]
    assert out.shape == x.shape and out.dtype == x.dtype
    assert jnp.allclose(out, ref, atol=1e-6, rtol=1e-6), "2D path mismatch"

    # --- Case 2: lane-aligned d_model (128 -> 3D path) ----------------------
    d_model2, seq_len2, batch2, seq2 = 128, 32, 2, 16
    x2 = jax.random.normal(k2, (batch2, seq2, d_model2), dtype=jnp.float32)
    pe2 = make_positional_encoding(seq_len2, d_model2, dtype=jnp.float32)
    out2 = positional_encoding_forward(x2, pe2, dropout_p=0.1, training=False)
    out2 = jax.block_until_ready(out2)
    ref2 = x2 + pe2[:seq2][None, :, :]
    assert jnp.allclose(out2, ref2, atol=1e-6, rtol=1e-6), "3D path mismatch"

    # TODO(synk): training-mode dropout is implemented in-kernel with the TPU
    # hardware PRNG (pltpu.prng_seed / prng_random_bits); it runs only on real
    # TPUs (no CPU/interpret lowering) and cannot bit-match torch.nn.Dropout's
    # random stream, so it is not exercised here.

    print("KERNEL_OK")
</pallas_src>

<mosaic_0001>
module attributes {stable_mosaic.version = 11 : i64} {
  func.func @_pe_kernel_2d(%arg0: i32, %arg1: memref<1xi32, #tpu.memory_space<smem>>, %arg2: memref<2x128xf32, #tpu.memory_space<vmem>>, %arg3: memref<1x128xf32, #tpu.memory_space<vmem>>, %arg4: memref<2x128xf32, #tpu.memory_space<vmem>>) attributes {dimension_semantics = [#tpu.dimension_semantics<parallel>], iteration_bounds = array<i64: 2>, scalar_prefetch = 1 : i64, scratch_operands = 0 : i64, tpu.core_type = #tpu.core_type<tc>, window_params = [{transform_indices = @transform_0, window_bounds = array<i64: 2, 128>}, {transform_indices = @transform_1, window_bounds = array<i64: 1, 128>}, {transform_indices = @transform_2, window_bounds = array<i64: 2, 128>}]} {
    %c0 = arith.constant 0 : index
    %c0_0 = arith.constant 0 : index
    %0 = vector.load %arg2[%c0, %c0_0] : memref<2x128xf32, #tpu.memory_space<vmem>>, vector<2x128xf32>
    %c0_1 = arith.constant 0 : index
    %c0_2 = arith.constant 0 : index
    %1 = vector.load %arg3[%c0_1, %c0_2] : memref<1x128xf32, #tpu.memory_space<vmem>>, vector<1x128xf32>
    %2 = vector.broadcast %1 : vector<1x128xf32> to vector<2x128xf32>
    %3 = arith.addf %0, %2 : vector<2x128xf32>
    %c0_3 = arith.constant 0 : index
    %c0_4 = arith.constant 0 : index
    %4 = vector.load %arg4[%c0_3, %c0_4] : memref<2x128xf32, #tpu.memory_space<vmem>>, vector<2x128xf32>
    tpu.vector_store %arg4[%c0_3, %c0_4], %3 {strides = array<i32>} : memref<2x128xf32, #tpu.memory_space<vmem>>, vector<2x128xf32>,
    return
  }
  func.func @transform_0(%arg0: i32, %arg1: memref<1xi32, #tpu.memory_space<smem>>) -> (i32, i32) {
    %c0_i32 = arith.constant 0 : i32
    %c0_i32_0 = arith.constant 0 : i32
    return %c0_i32, %arg0 : i32, i32
  }
  func.func @transform_1(%arg0: i32, %arg1: memref<1xi32, #tpu.memory_space<smem>>) -> (i32, i32) {
    %c0_i32 = arith.constant 0 : i32
    %c0_i32_0 = arith.constant 0 : i32
    return %c0_i32, %arg0 : i32, i32
  }
  func.func @transform_2(%arg0: i32, %arg1: memref<1xi32, #tpu.memory_space<smem>>) -> (i32, i32) {
    %c0_i32 = arith.constant 0 : i32
    %c0_i32_0 = arith.constant 0 : i32
    return %c0_i32, %arg0 : i32, i32
  }
}

</mosaic_0001>

<bundles_post_ra>
// kernel: tpu_custom_call.1
= control target key start
LH: loop header
LB: loop body
LE: loop exit
PB: predicated region body
PF: predicated region fallthrough
CT: control target
= control target key end

     0   :  { %9 = vsyncpa [#allocation5], 0  ;;  %s588_s0 = inlined_call_operand.<no memory space> [shape: s32[1], index: 0, kind: input, shape index: {}]   ;;  %s589_s1 = inlined_call_operand.hbm [shape: f32[2,256], index: 1, kind: input, shape index: {}]   ;;  %s590_s2 = inlined_call_operand.vmem [shape: f32[1,256], index: 2, kind: input, shape index: {}]   ;;  %s591_s3 = inlined_call_operand.hbm [shape: f32[2,256], index: 3, kind: output, shape index: {}]  }
   0x1   :  { %11 = vsyncpa [#allocation5 + $0x1], 0 }
   0x2   :  { %12 = vsyncpa [#allocation6], 0 }
   0x3   :  { %14 = vsyncpa [#allocation6 + $0x1], 0  ;;  %s456_s12 = smov 0   ;;  %s458_s13 = smov 0  }
   0x4   :  { %s460_s14 = smov 0   ;;  %s462_s0 = smov 0  }
   0x5 LB: > { %s477_s15 = sadd.s32 4294967295, %s434_s0   ;;  %s279_s16 = sadd.s32 4294967294, %s434_s0   ;;  %s434_s0 = sphi %s462_s0, %s601_s0   ;;  %s430_s14 = sphi %s460_s14, %s600_s14   ;;  %s426_s13 = sphi %s458_s13, %s599_s13   ;;  %s422_s12 = sphi %s456_s12, %s598_s12  }
   0x6   : > { %s481_s17 = sadd.s32 1, %s434_s0   ;;  %s27_s18 = sadd.s32 1, %s430_s14 }
   0x7   : > { %s24_s19 = ssub.s32 %s434_s0, %s481_s17  ;;  %p34_p0 = scmp.ne.s32.totalorder %s430_s14, %s426_s13 }
   0x8   : > { %p25_p1 = scmp.eq.s32.totalorder %s24_s19, 0  ;;  %p35_p2 = scmp.eq.s32.totalorder %s434_s0, 0 }
   0x9   : > { %p40_p3 = scmp.ne.s32.totalorder %s426_s13, %s422_s12  ;;  %p41_p4 = scmp.eq.s32.totalorder %s477_s15, 0 }
   0xa   : > { %s493_s20 = scalar_select %p25_p1, %s430_s14, %s27_s18  }
   0xb   : > { %p495_p5 = por %p35_p2, %p34_p0  ;;  %p499_p6 = por %p41_p4, %p40_p3 }
   0xc   : > { %p90_p7 = scmp.eq.s32.totalorder %s477_s15, 1  ;;  %p96_p8 = scmp.eq.s32.totalorder %s279_s16, 1 }
   0xd   : > { %p303_p10 = scmp.lt.s32.totalorder %s434_s0, 2  ;;  %s116_s25 = sand.u32 1, %s430_s14  }
   0xe   : > { %p506_p11 = por %p90_p7, %p34_p0  ;;  %p510_p12 = por %p96_p8, %p40_p3 }
   0xf   : > { %s283_s26 = sshll.u32 %s434_s0, 1  ;;  %s282_s27 = sshll.u32 %s116_s25, 1 }
  0x10   : > { %s124_s30 = scalar_lea.hbm %s589_s1, %s283_s26  ;;  %s120_s5 = scalar_lea.vmem [#allocation4], %s282_s27 }
  0x11   : > { %s126_s4 = sshll.u32 %s124_s30, 4  ;;  %s128_s6 = sshll.u32 %s120_s5, 4  ;;  %s127_s4 = int_to_ptr.hbm [resolvable:$true] %s126_s4  ;;  %s129_s6 = int_to_ptr.vmem [resolvable:$true] %s128_s6 }
  0x12   : > { %p521_p13 = pnand %p303_p10, %p495_p5  ;;  %p284_p0 = scmp.ge.s32.totalorder %s434_s0, 1 }
  0x13   : > { %p139_p1 = scmp.lt.s32.totalorder %s434_s0, 3  ;;  %s117_s8 = scalar_lea.sflag [#allocation5], %s116_s25 }
  0x14   : > { %s338_s9 = sshra.s32 %s127_s4, 4  ;;  %p342_p3 = pneg %p521_p13  ;;  %s339_s9 = int_to_ptr.hbm [resolvable:$true] %s338_s9 }
  0x15   : > { %s340_s10 = scalar_lea.hbm %s339_s9, 2  ;;  %s345_s18 = scalar_lea.hbm %s589_s1, 4 }
  0x16   : > { %p341_p2 = scmp.ne.s32.totalorder %s339_s9, %s340_s10  ;;  %p346_p5 = scmp.lt.s32.totalorder %s339_s9, %s589_s1 }
  0x17   : > { %p347_p8 = scmp.lt.s32.totalorder %s345_s18, %s340_s10 }
  0x18   : > { %p343_p4 = pnand %p342_p3, %p341_p2 }
  0x19   : > { %p348_p10 = por %p347_p8, %p346_p5 }
  0x1a   : > { %p344_p7 = pneg %p343_p4 }
  0x1c   : > { %p349_p9 = pnand %p348_p10, %p344_p7 }
  0x1e   : > { %352 = shalt.err (!%p349_p9)
}
  0x1f   : > { %298 = dma.hbm_to_vmem [thread:$0]  (!%p521_p13), %s127_s4, 32, %s129_s6, %s117_s8  }
  0x20   : > { %p140_p2 = pnand %p284_p0, %p139_p1 }
  0x21   : > { %s542_s25 = sand.u32 (!%p140_p2), 1, %s426_s13  }
  0x22   : > { %143 = sbr.rel (%p140_p2) target bundleno = 57 (0x39), region = 28  ;;  %s285_s26 = sshll.u32 (!%p140_p2), %s542_s25, 1 }
  0x23   : > { %s146_s27 = scalar_lea.sflag (!%p140_p2), [#allocation5], %s542_s25  ;;  %s149_s28 = scalar_lea.vmem (!%p140_p2), [#allocation4], %s285_s26 }
  0x27   : > { %413 = dma.done.wait (%p499_p6), %s146_s27, 32  }
  0x28   : > { %415 = vsyncadd (%p499_p6), %s146_s27, 4294967264  ;;  %p174_p9 = scmp.lt.s32.totalorder %s477_s15, 1  ;;  %s288_s30 = sshll.u32 %s477_s15, 1  ;;  %v177_v0 = vld [vmem:[%s149_s28] sm:$0x3] }
  0x29   : > { %s195_s9 = scalar_lea.hbm %s591_s3, %s288_s30  ;;  %s173_s10 = scalar_lea.vmem [#allocation7], %s285_s26 }
  0x2a   : > { %s175_s29 = scalar_select %p174_p9, %s477_s15, 1 }
  0x2b   : > { %s197_s11 = sshll.u32 %s173_s10, 4  ;;  %s199_s22 = sshll.u32 %s195_s9, 4  ;;  %s198_s11 = int_to_ptr.vmem [resolvable:$true] %s197_s11  ;;  %s200_s22 = int_to_ptr.hbm [resolvable:$true] %s199_s22 }
  0x2c   : > { %s176_s6 = scalar_lea.vmem %s590_s2, %s175_s29  ;;  %s185_s16 = scalar_lea.sflag [#allocation6], %s542_s25 }
  0x2d   : > { %v337_v1 = vld [vmem:[%s176_s6] ss:$0 sm:$0xff]  ;;  %s382_s15 = sshra.s32 %s200_s22, 4  ;;  %s388_s26 = scalar_lea.hbm %s591_s3, 4  ;;  %s383_s15 = int_to_ptr.hbm [resolvable:$true] %s382_s15 }
  0x2e   : > { %v182_v2 = vadd.f32 %v337_v1, %v177_v0  ;;  %s384_s18 = scalar_lea.hbm %s383_s15, 2  ;;  %p389_p1 = scmp.lt.s32.totalorder %s383_s15, %s591_s3 }
  0x2f   : > { %p385_p6 = scmp.ne.s32.totalorder %s383_s15, %s384_s18  ;;  %p390_p3 = scmp.lt.s32.totalorder %s388_s26, %s384_s18 }
  0x30   : > { %183 = vst [vmem:[%s173_s10] sm:$0x3] %v182_v2 }
  0x31   : > { %p386_p13 = pnand %p385_p6, %p506_p11  ;;  %p391_p4 = por %p390_p3, %p389_p1 }
  0x33   : > { %p387_p0 = pneg %p386_p13 }
  0x35   : > { %p392_p7 = pnand %p391_p4, %p387_p0 }
  0x37   : > { %395 = shalt.err (!%p392_p7)
}
  0x38   : > { %293 = dma.vmem_to_hbm [thread:$0]  (%p506_p11), %s198_s11, 32, %s200_s22, %s185_s16  }
  0x39 PF: > { %s211_s25 = sand.u32 1, %s422_s12   ;;  %p597_p5 = scmp.ge.s32.totalorder %s434_s0, 2 }
  0x3a   : > { %s212_s28 = scalar_lea.sflag [#allocation6], %s211_s25 }
  0x3b   : > { %p300_p8 = pnand %p597_p5, %p510_p12 }
  0x3d   : > { %p301_p10 = pneg %p300_p8 }
  0x3f   : > { %417 = dma.done.wait (%p301_p10), %s212_s28, 32  }
  0x40   : > { %419 = vsyncadd (%p301_p10), %s212_s28, 4294967264  ;;  %p17_p2 = scmp.ge.s32.totalorder %s481_s17, 4   ;;  %s598_s12 = smov %s426_s13 }
  0x41   : > { %s599_s13 = smov %s430_s14  ;;  %s600_s14 = smov %s493_s20 }
  0x42   : > { %s601_s0 = smov %s481_s17  ;;  %19 = sbr.rel (!%p17_p2) target bundleno = 5 (0x5), region = 76 }
  0x47   :  { %218 = vsyncpa [#allocation5], 1 }
  0x48   :  { %220 = vsyncpa [#allocation5 + $0x1], 1 }
  0x49   :  { %221 = vsyncpa [#allocation6], 1 }
  0x4a   :  { %223 = vsyncpa [#allocation6 + $0x1], 1 }

</bundles_post_ra>
